<compile_context>
chip_gen: v6e
topology: v6e:2x2x1
jax: 0.10.0
libtpu: 0.0.40
codegen_flags: <defaults>
</compile_context>

<pallas_src>
import jax
import jax.numpy as jnp
from jax.experimental import pallas as pl
from jax.experimental.pallas import tpu as pltpu

# ---------------- configuration ----------------------------------------------
NUM_LAYERS = 4        # num_layers
LAYER_WIDTH = 32      # layer_width
NR_PARAMS = 2         # nr_params
ECD = 8               # expansion_coefficient_dim
ICL = 16              # input_chunk_length
TL = 8                # target_length
BATCH = 256           # demo batch size
DEFAULT_BATCH_TILE = 1024   # rows per grid step (whole batch in 1 step at B=256)

OUT_W = ICL + NR_PARAMS * TL   # 32: backcast || forecast-flat
TAIL_PAD = 128                 # lane-dense output width (unmasked stores)
# g_type = GENERIC, batch_norm = False, dropout = 0.0, activation = 'ReLU'


def _round_up(n, m):
    return ((n + m - 1) // m) * m


# ---------------- Pallas kernel ----------------------------------------------
def _block_kernel(x_ref, fcw_ref, fcb_ref, wt_ref, bt_ref, out_ref):
    # x_ref   : (tile, LAYER_WIDTH)           input, zero-padded to W columns
    # fcw_ref : (NUM_LAYERS, W, W)            FC weights (layer 0 row-padded)
    # fcb_ref : (NUM_LAYERS, 1, W)            FC biases
    # wt_ref  : (W, TAIL_PAD)                 folded backcast||forecast tail (zero-padded)
    # bt_ref  : (1, TAIL_PAD)                 folded tail bias (zero-padded)
    # out_ref : (tile, TAIL_PAD)              [:, :ICL]=x_hat, [:, ICL:OUT_W]=y_flat
    h = x_ref[...]
    for l in range(NUM_LAYERS):          # static unroll
        h = jnp.maximum(
            jnp.dot(h, fcw_ref[l], preferred_element_type=jnp.float32) + fcb_ref[l],
            0.0,
        )
    # Single fused tail matmul + one lane-dense (128-wide) unmasked store.
    out_ref[...] = (
        jnp.dot(h, wt_ref[...], preferred_element_type=jnp.float32) + bt_ref[...]
    )


# ---------------- one-time host-side parameter folding / packing ---------------
def fold_params(params):
    """Fold theta-projection + GENERIC generators into one tail matmul and pack
    all FC parameters into stacked arrays (5 kernel operands total)."""
    p = list(params)
    fc = p[: 2 * NUM_LAYERS]
    w_bl, b_bl, w_fl, b_fl, w_bg, b_bg, w_fg, b_fg = p[2 * NUM_LAYERS:]

    # --- FC stack packing: zero-pad layer-0 weight rows (ICL -> LAYER_WIDTH) ---
    fcw = []
    fcb = []
    for l in range(NUM_LAYERS):
        w, b = fc[2 * l], fc[2 * l + 1]
        if w.shape[0] < LAYER_WIDTH:
            w = jnp.pad(w, ((0, LAYER_WIDTH - w.shape[0]), (0, 0)))
        fcw.append(w)
        fcb.append(b)
    fcw = jnp.stack(fcw, axis=0)                       # (NUM_LAYERS, W, W)
    fcb = jnp.stack(fcb, axis=0)                       # (NUM_LAYERS, 1, W)

    # --- backcast: h @ w_bl + b_bl -> @ w_bg + b_bg  (fold, no nonlinearity) ---
    w_back = w_bl @ w_bg                               # (W, ICL)
    b_back = b_bl @ w_bg + b_bg                        # (1, ICL)

    # --- forecast: block-diagonal generator applied to each nr_params slice ----
    bd = jnp.zeros((NR_PARAMS * ECD, NR_PARAMS * TL), jnp.float32)
    for q in range(NR_PARAMS):
        bd = bd.at[q * ECD:(q + 1) * ECD, q * TL:(q + 1) * TL].set(w_fg)
    w_fore = w_fl @ bd                                 # (W, NR_PARAMS*TL)
    b_fore = b_fl @ bd + jnp.tile(b_fg, (1, NR_PARAMS))  # (1, NR_PARAMS*TL)

    # --- fused tail, zero-padded to 128 lanes for unmasked stores --------------
    w_tail = jnp.concatenate([w_back, w_fore], axis=1)   # (W, OUT_W)
    b_tail = jnp.concatenate([b_back, b_fore], axis=1)   # (1, OUT_W)
    w_tail = jnp.pad(w_tail, ((0, 0), (0, TAIL_PAD - OUT_W)))
    b_tail = jnp.pad(b_tail, ((0, 0), (0, TAIL_PAD - OUT_W)))

    return fcw, fcb, w_tail, b_tail


# ---------------- wrapper ------------------------------------------------------
def nbeats_block(x, folded, *, batch_tile=DEFAULT_BATCH_TILE):
    fcw, fcb, w_tail, b_tail = folded
    B = x.shape[0]

    # One big grid step when possible; tile is a multiple of 8 sublanes.
    tile = min(batch_tile, _round_up(B, 8))
    padded_b = _round_up(B, tile)
    # Zero-pad batch rows and feature columns (ICL -> LAYER_WIDTH) to match the
    # row-padded layer-0 weight.
    x = jnp.pad(x, ((0, padded_b - B), (0, LAYER_WIDTH - ICL)))
    steps = padded_b // tile
    grid = (steps,)

    def const_spec(a):
        nd = a.ndim
        return pl.BlockSpec(a.shape, lambda i, _nd=nd: (0,) * _nd)  # VMEM-resident

    in_specs = [
        pl.BlockSpec((tile, LAYER_WIDTH), lambda i: (i, 0)),
        const_spec(fcw),
        const_spec(fcb),
        const_spec(w_tail),
        const_spec(b_tail),
    ]
    out_specs = pl.BlockSpec((tile, TAIL_PAD), lambda i: (i, 0))
    out_shape = jax.ShapeDtypeStruct((padded_b, TAIL_PAD), jnp.float32)

    # Only shard across v7x TensorCores when each core gets several steps.
    semantics = ("parallel",) if steps >= 4 else ("arbitrary",)

    out = pl.pallas_call(
        _block_kernel,
        grid=grid,
        in_specs=in_specs,
        out_specs=out_specs,
        out_shape=out_shape,
        compiler_params=pltpu.CompilerParams(dimension_semantics=semantics),
    )(x, fcw, fcb, w_tail, b_tail)

    out = out[:B]
    x_hat = out[:, :ICL]
    y_flat = out[:, ICL:OUT_W]
    # PyTorch: y (B, nr_params, TL) contiguous -> .reshape(B, TL, nr_params)
    y_hat = y_flat.reshape(B, TL, NR_PARAMS)
    return x_hat, y_hat


# ---------------- deterministic parameter init ---------------------------------
def init_params(key):
    params = []
    n_linear = NUM_LAYERS + 4
    keys = jax.random.split(key, 2 * n_linear)
    kit = iter(keys)

    def linear(in_dim, out_dim):
        w = jax.random.normal(next(kit), (in_dim, out_dim), jnp.float32) * 0.1
        b = jax.random.normal(next(kit), (1, out_dim), jnp.float32) * 0.1
        return w, b

    # FC stack
    w, b = linear(ICL, LAYER_WIDTH); params += [w, b]
    for _ in range(NUM_LAYERS - 1):
        w, b = linear(LAYER_WIDTH, LAYER_WIDTH); params += [w, b]
    # backcast / forecast theta layers
    w, b = linear(LAYER_WIDTH, ECD); params += [w, b]
    w, b = linear(LAYER_WIDTH, NR_PARAMS * ECD); params += [w, b]
    # GENERIC generators
    w, b = linear(ECD, ICL); params += [w, b]
    w, b = linear(ECD, TL); params += [w, b]
    return params


# ---------------- pure-JAX reference (unfolded, matches PyTorch forward) --------
def reference(x, params):
    p = list(params)
    h = x
    idx = 0
    for _ in range(NUM_LAYERS):
        w, b = p[idx], p[idx + 1]; idx += 2
        h = jnp.maximum(h @ w + b, 0.0)
    w_bl, b_bl, w_fl, b_fl, w_bg, b_bg, w_fg, b_fg = p[idx:idx + 8]
    theta_b = h @ w_bl + b_bl
    theta_f = (h @ w_fl + b_fl).reshape(x.shape[0], NR_PARAMS, ECD)
    x_hat = theta_b @ w_bg + b_bg
    y = jnp.einsum("bpe,et->bpt", theta_f, w_fg) + b_fg[0]
    y_hat = y.reshape(x.shape[0], TL, NR_PARAMS)
    return x_hat, y_hat


if __name__ == "__main__":
    key = jax.random.PRNGKey(0)
    kx, kp = jax.random.split(key)
    x = jax.random.normal(kx, (BATCH, ICL), jnp.float32)
    params = init_params(kp)
    folded = fold_params(params)          # one-time host-side prep

    x_hat, y_hat = nbeats_block(x, folded)
    jax.block_until_ready((x_hat, y_hat))

    x_ref, y_ref = reference(x, params)
    assert x_hat.shape == (BATCH, ICL)
    assert y_hat.shape == (BATCH, TL, NR_PARAMS)
    # folding reassociates f32 sums -> tiny numerical differences are expected
    assert jnp.allclose(x_hat, x_ref, rtol=1e-4, atol=1e-4)
    assert jnp.allclose(y_hat, y_ref, rtol=1e-4, atol=1e-4)

    print("KERNEL_OK")
</pallas_src>

<mosaic_0001>
module attributes {stable_mosaic.version = 11 : i64} {
  func.func @_block_kernel(%arg0: i32, %arg1: memref<256x32xf32, #tpu.memory_space<vmem>>, %arg2: memref<4x32x32xf32, #tpu.memory_space<vmem>>, %arg3: memref<4x1x32xf32, #tpu.memory_space<vmem>>, %arg4: memref<32x128xf32, #tpu.memory_space<vmem>>, %arg5: memref<1x128xf32, #tpu.memory_space<vmem>>, %arg6: memref<256x128xf32, #tpu.memory_space<vmem>>) attributes {dimension_semantics = [#tpu.dimension_semantics<arbitrary>], iteration_bounds = array<i64: 1>, scalar_prefetch = 0 : i64, scratch_operands = 0 : i64, tpu.core_type = #tpu.core_type<tc>, window_params = [{transform_indices = @transform_0, window_bounds = array<i64: 256, 32>}, {pipeline_mode = #tpu.pipeline_mode<synchronous>, transform_indices = @transform_1, window_bounds = array<i64: 4, 32, 32>}, {pipeline_mode = #tpu.pipeline_mode<synchronous>, transform_indices = @transform_2, window_bounds = array<i64: 4, 1, 32>}, {pipeline_mode = #tpu.pipeline_mode<synchronous>, transform_indices = @transform_3, window_bounds = array<i64: 32, 128>}, {pipeline_mode = #tpu.pipeline_mode<synchronous>, transform_indices = @transform_4, window_bounds = array<i64: 1, 128>}, {transform_indices = @transform_5, window_bounds = array<i64: 256, 128>}]} {
    %c0 = arith.constant 0 : index
    %c0_0 = arith.constant 0 : index
    %0 = vector.load %arg1[%c0, %c0_0] : memref<256x32xf32, #tpu.memory_space<vmem>>, vector<256x32xf32>
    %c0_1 = arith.constant 0 : index
    %c0_2 = arith.constant 0 : index
    %c0_3 = arith.constant 0 : index
    %1 = vector.load %arg2[%c0_1, %c0_2, %c0_3] : memref<4x32x32xf32, #tpu.memory_space<vmem>>, vector<1x32x32xf32>
    %2 = vector.shape_cast %1 : vector<1x32x32xf32> to vector<32x32xf32>
    %cst = arith.constant dense<0.000000e+00> : vector<256x32xf32>
    %3 = tpu.matmul %0, %2, %cst {dimension_numbers = #tpu.dot_dimension_numbers<[1], [0], [0], [1], [0, 0, 1, 1], [], []>} : vector<256x32xf32>, vector<32x32xf32>, vector<256x32xf32> -> vector<256x32xf32>
    %c0_4 = arith.constant 0 : index
    %c0_5 = arith.constant 0 : index
    %c0_6 = arith.constant 0 : index
    %4 = vector.load %arg3[%c0_4, %c0_5, %c0_6] : memref<4x1x32xf32, #tpu.memory_space<vmem>>, vector<1x1x32xf32>
    %5 = vector.shape_cast %4 : vector<1x1x32xf32> to vector<1x32xf32>
    %6 = vector.broadcast %5 : vector<1x32xf32> to vector<256x32xf32>
    %7 = arith.addf %3, %6 : vector<256x32xf32>
    %cst_7 = arith.constant 0.000000e+00 : f32
    %8 = vector.broadcast %cst_7 : f32 to vector<256x32xf32>
    %9 = arith.maximumf %7, %8 : vector<256x32xf32>
    %c1 = arith.constant 1 : index
    %c0_8 = arith.constant 0 : index
    %c0_9 = arith.constant 0 : index
    %10 = vector.load %arg2[%c1, %c0_8, %c0_9] : memref<4x32x32xf32, #tpu.memory_space<vmem>>, vector<1x32x32xf32>
    %11 = vector.shape_cast %10 : vector<1x32x32xf32> to vector<32x32xf32>
    %cst_10 = arith.constant dense<0.000000e+00> : vector<256x32xf32>
    %12 = tpu.matmul %9, %11, %cst_10 {dimension_numbers = #tpu.dot_dimension_numbers<[1], [0], [0], [1], [0, 0, 1, 1], [], []>} : vector<256x32xf32>, vector<32x32xf32>, vector<256x32xf32> -> vector<256x32xf32>
    %c1_11 = arith.constant 1 : index
    %c0_12 = arith.constant 0 : index
    %c0_13 = arith.constant 0 : index
    %13 = vector.load %arg3[%c1_11, %c0_12, %c0_13] : memref<4x1x32xf32, #tpu.memory_space<vmem>>, vector<1x1x32xf32>
    %14 = vector.shape_cast %13 : vector<1x1x32xf32> to vector<1x32xf32>
    %15 = vector.broadcast %14 : vector<1x32xf32> to vector<256x32xf32>
    %16 = arith.addf %12, %15 : vector<256x32xf32>
    %cst_14 = arith.constant 0.000000e+00 : f32
    %17 = vector.broadcast %cst_14 : f32 to vector<256x32xf32>
    %18 = arith.maximumf %16, %17 : vector<256x32xf32>
    %c2 = arith.constant 2 : index
    %c0_15 = arith.constant 0 : index
    %c0_16 = arith.constant 0 : index
    %19 = vector.load %arg2[%c2, %c0_15, %c0_16] : memref<4x32x32xf32, #tpu.memory_space<vmem>>, vector<1x32x32xf32>
    %20 = vector.shape_cast %19 : vector<1x32x32xf32> to vector<32x32xf32>
    %cst_17 = arith.constant dense<0.000000e+00> : vector<256x32xf32>
    %21 = tpu.matmul %18, %20, %cst_17 {dimension_numbers = #tpu.dot_dimension_numbers<[1], [0], [0], [1], [0, 0, 1, 1], [], []>} : vector<256x32xf32>, vector<32x32xf32>, vector<256x32xf32> -> vector<256x32xf32>
    %c2_18 = arith.constant 2 : index
    %c0_19 = arith.constant 0 : index
    %c0_20 = arith.constant 0 : index
    %22 = vector.load %arg3[%c2_18, %c0_19, %c0_20] : memref<4x1x32xf32, #tpu.memory_space<vmem>>, vector<1x1x32xf32>
    %23 = vector.shape_cast %22 : vector<1x1x32xf32> to vector<1x32xf32>
    %24 = vector.broadcast %23 : vector<1x32xf32> to vector<256x32xf32>
    %25 = arith.addf %21, %24 : vector<256x32xf32>
    %cst_21 = arith.constant 0.000000e+00 : f32
    %26 = vector.broadcast %cst_21 : f32 to vector<256x32xf32>
    %27 = arith.maximumf %25, %26 : vector<256x32xf32>
    %c3 = arith.constant 3 : index
    %c0_22 = arith.constant 0 : index
    %c0_23 = arith.constant 0 : index
    %28 = vector.load %arg2[%c3, %c0_22, %c0_23] : memref<4x32x32xf32, #tpu.memory_space<vmem>>, vector<1x32x32xf32>
    %29 = vector.shape_cast %28 : vector<1x32x32xf32> to vector<32x32xf32>
    %cst_24 = arith.constant dense<0.000000e+00> : vector<256x32xf32>
    %30 = tpu.matmul %27, %29, %cst_24 {dimension_numbers = #tpu.dot_dimension_numbers<[1], [0], [0], [1], [0, 0, 1, 1], [], []>} : vector<256x32xf32>, vector<32x32xf32>, vector<256x32xf32> -> vector<256x32xf32>
    %c3_25 = arith.constant 3 : index
    %c0_26 = arith.constant 0 : index
    %c0_27 = arith.constant 0 : index
    %31 = vector.load %arg3[%c3_25, %c0_26, %c0_27] : memref<4x1x32xf32, #tpu.memory_space<vmem>>, vector<1x1x32xf32>
    %32 = vector.shape_cast %31 : vector<1x1x32xf32> to vector<1x32xf32>
    %33 = vector.broadcast %32 : vector<1x32xf32> to vector<256x32xf32>
    %34 = arith.addf %30, %33 : vector<256x32xf32>
    %cst_28 = arith.constant 0.000000e+00 : f32
    %35 = vector.broadcast %cst_28 : f32 to vector<256x32xf32>
    %36 = arith.maximumf %34, %35 : vector<256x32xf32>
    %c0_29 = arith.constant 0 : index
    %c0_30 = arith.constant 0 : index
    %37 = vector.load %arg4[%c0_29, %c0_30] : memref<32x128xf32, #tpu.memory_space<vmem>>, vector<32x128xf32>
    %cst_31 = arith.constant dense<0.000000e+00> : vector<256x128xf32>
    %38 = tpu.matmul %36, %37, %cst_31 {dimension_numbers = #tpu.dot_dimension_numbers<[1], [0], [0], [1], [0, 0, 1, 1], [], []>} : vector<256x32xf32>, vector<32x128xf32>, vector<256x128xf32> -> vector<256x128xf32>
    %c0_32 = arith.constant 0 : index
    %c0_33 = arith.constant 0 : index
    %39 = vector.load %arg5[%c0_32, %c0_33] : memref<1x128xf32, #tpu.memory_space<vmem>>, vector<1x128xf32>
    %40 = vector.broadcast %39 : vector<1x128xf32> to vector<256x128xf32>
    %41 = arith.addf %38, %40 : vector<256x128xf32>
    %c0_34 = arith.constant 0 : index
    %c0_35 = arith.constant 0 : index
    %42 = vector.load %arg6[%c0_34, %c0_35] : memref<256x128xf32, #tpu.memory_space<vmem>>, vector<256x128xf32>
    tpu.vector_store %arg6[%c0_34, %c0_35], %41 {strides = array<i32>} : memref<256x128xf32, #tpu.memory_space<vmem>>, vector<256x128xf32>,
    return
  }
  func.func @transform_0(%arg0: i32) -> (i32, i32) {
    %c0_i32 = arith.constant 0 : i32
    %c0_i32_0 = arith.constant 0 : i32
    return %arg0, %c0_i32 : i32, i32
  }
  func.func @transform_1(%arg0: i32) -> (i32, i32, i32) {
    %c0_i32 = arith.constant 0 : i32
    %c0_i32_0 = arith.constant 0 : i32
    %c0_i32_1 = arith.constant 0 : i32
    %c0_i32_2 = arith.constant 0 : i32
    return %c0_i32, %c0_i32_0, %c0_i32_1 : i32, i32, i32
  }
  func.func @transform_2(%arg0: i32) -> (i32, i32, i32) {
    %c0_i32 = arith.constant 0 : i32
    %c0_i32_0 = arith.constant 0 : i32
    %c0_i32_1 = arith.constant 0 : i32
    %c0_i32_2 = arith.constant 0 : i32
    return %c0_i32, %c0_i32_0, %c0_i32_1 : i32, i32, i32
  }
  func.func @transform_3(%arg0: i32) -> (i32, i32) {
    %c0_i32 = arith.constant 0 : i32
    %c0_i32_0 = arith.constant 0 : i32
    %c0_i32_1 = arith.constant 0 : i32
    return %c0_i32, %c0_i32_0 : i32, i32
  }
  func.func @transform_4(%arg0: i32) -> (i32, i32) {
    %c0_i32 = arith.constant 0 : i32
    %c0_i32_0 = arith.constant 0 : i32
    %c0_i32_1 = arith.constant 0 : i32
    return %c0_i32, %c0_i32_0 : i32, i32
  }
  func.func @transform_5(%arg0: i32) -> (i32, i32) {
    %c0_i32 = arith.constant 0 : i32
    %c0_i32_0 = arith.constant 0 : i32
    return %arg0, %c0_i32 : i32, i32
  }
}

</mosaic_0001>

<bundles_post_ra>
// kernel: tpu_custom_call.1
= control target key start
LH: loop header
LB: loop body
LE: loop exit
PB: predicated region body
PF: predicated region fallthrough
CT: control target
= control target key end

     0   :  { %vm64_vm0 = vcmask 261120   ;;  %s3115_s0 = inlined_call_operand.vmem [shape: f32[256,32], index: 0, kind: input, shape index: {}]   ;;  %s3116_s1 = inlined_call_operand.vmem [shape: f32[4,32,32], index: 1, kind: input, shape index: {}]   ;;  %s3117_s2 = inlined_call_operand.vmem [shape: f32[4,1,32], index: 2, kind: input, shape index: {}]   ;;  %s3118_s3 = inlined_call_operand.vmem [shape: f32[32,128], index: 3, kind: input, shape index: {}]   ;;  %s3119_s4 = inlined_call_operand.vmem [shape: f32[1,128], index: 4, kind: input, shape index: {}]   ;;  %s3120_s5 = inlined_call_operand.hbm [shape: f32[256,128], index: 5, kind: output, shape index: {}]  }
   0x1   :  { %v56_v0 = vld [vmem:[%s3116_s1 + $0x18] sm:$0xff]  ;;  %v55_v1 = vld [vmem:[%s3116_s1 + $0x10] sm:$0xff]  ;;  %v21_v2 = vld [vmem:[%s3115_s0] sm:$0xff] }
   0x2   :  { %2256 = vmatprep.subr.mxu0 %v56_v0  ;;  %2536 = vmatprep.subr.mxu1 %v56_v0  ;;  %v54_v3 = vld [vmem:[%s3116_s1 + $0x8] sm:$0xff]  ;;  %v53_v4 = vld [vmem:[%s3116_s1] sm:$0xff]  ;;  %v23_v6 = vld [vmem:[%s3115_s0 + $0x10] sm:$0xff] }
   0x3   :  { %2257 = vmatpush3.msra.mxu0 %v56_v0  ;;  %2264 = vmatprep.mubr.msk.f32.mxu0 %vm64_vm0, %v21_v2  ;;  %v22_v5 = vld [vmem:[%s3115_s0 + $0x8] sm:$0xff]  ;;  %v37_v7 = vld [vmem:[%s3115_s0 + $0x80] sm:$0xff]  ;;  %v39_v9 = vld [vmem:[%s3115_s0 + $0x90] sm:$0xff] }
   0x4   :  { %2258 = vmatprep.subr.mxu0 %v55_v1  ;;  %2540 = vmatpush3.msra.mxu1 %v56_v0  ;;  %v38_v8 = vld [vmem:[%s3115_s0 + $0x88] sm:$0xff]  ;;  %v24_v10 = vld [vmem:[%s3115_s0 + $0x18] sm:$0xff]  ;;  %v25_v11 = vld [vmem:[%s3115_s0 + $0x20] sm:$0xff] }
   0x5   :  { %2259 = vmatpush3.msra.mxu0 %v55_v1  ;;  %2537 = vmatprep.subr.mxu1 %v55_v1  ;;  %v40_v12 = vld [vmem:[%s3115_s0 + $0x98] sm:$0xff]  ;;  %v1931_v14 = vld [vmem:[%s3116_s1 + $0x30] sm:$0xff]  ;;  %v41_v15 = vld [vmem:[%s3115_s0 + $0xa0] sm:$0xff] }
   0x6   :  { %2260 = vmatprep.subr.mxu0 %v54_v3  ;;  %2541 = vmatpush3.msra.mxu1 %v55_v1  ;;  %v1932_v13 = vld [vmem:[%s3116_s1 + $0x38] sm:$0xff] }
   0x7   :  { %2261 = vmatpush3.msra.mxu0 %v54_v3  ;;  %2538 = vmatprep.subr.mxu1 %v54_v3 }
   0x8   :  { %2262 = vmatprep.subr.mxu0 %v53_v4  ;;  %2542 = vmatpush3.msra.mxu1 %v54_v3 }
   0x9   :  { %2263 = vmatpush3.msra.mxu0 %v53_v4  ;;  %2539 = vmatprep.subr.mxu1 %v53_v4 }
   0xa   :  { %2265 = vmatmul.mubr.msk.f32.vlgmr.msra.gmra.mxu0 %vm64_vm0, %v22_v5  ;;  %2543 = vmatpush3.msra.mxu1 %v53_v4 }
   0xb   :  { %2267 = vmatprep.mubr.msk.f32.mxu0 %vm64_vm0, %v23_v6  ;;  %2288 = vmatprep.mubr.msk.f32.mxu1 %vm64_vm0, %v37_v7 }
   0xc   :  { %2289 = vmatmul.mubr.msk.f32.vlgmr.msra.gmra.mxu1 %vm64_vm0, %v38_v8  ;;  %2312 = vmatprep.subr.mxu1 %v1932_v13 }
   0xd   :  { %2291 = vmatprep.mubr.msk.f32.mxu1 %vm64_vm0, %v39_v9 }
   0xe   :  { %2268 = vmatmul.mubr.msk.f32.gmra.mxu0 %vm64_vm0, %v24_v10 }
   0xf   :  { %10 = vsyncpa [#allocation3], 0  ;;  %2270 = vmatprep.mubr.msk.f32.mxu0 %vm64_vm0, %v25_v11  ;;  %v26_v16 = vld [vmem:[%s3115_s0 + $0x28] sm:$0xff]  ;;  %2313 = vmatpush3.msra.mxu1 %v1932_v13  ;;  %v27_v18 = vld [vmem:[%s3115_s0 + $0x30] sm:$0xff] }
  0x10   :  { %v1930_v17 = vld [vmem:[%s3116_s1 + $0x28] sm:$0xff]  ;;  %2292 = vmatmul.mubr.msk.f32.gmra.mxu1 %vm64_vm0, %v40_v12  ;;  %2314 = vmatprep.subr.mxu1 %v1931_v14  ;;  %v1929_v20 = vld [vmem:[%s3116_s1 + $0x20] sm:$0xff]  ;;  %v43_v21 = vld [vmem:[%s3115_s0 + $0xb0] sm:$0xff] }
  0x11   :  { %2294 = vmatprep.mubr.msk.f32.mxu1 %vm64_vm0, %v41_v15  ;;  %v42_v19 = vld [vmem:[%s3115_s0 + $0xa8] sm:$0xff]  ;;  %2315 = vmatpush3.msra.mxu1 %v1931_v14  ;;  %v28_v22 = vld [vmem:[%s3115_s0 + $0x38] sm:$0xff]  ;;  %v29_v23 = vld [vmem:[%s3115_s0 + $0x40] sm:$0xff] }
  0x12   :  { %2271 = vmatmul.mubr.msk.f32.gmra.mxu0 %vm64_vm0, %v26_v16  ;;  %2316 = vmatprep.subr.mxu1 %v1930_v17  ;;  %v44_v24 = vld [vmem:[%s3115_s0 + $0xb8] sm:$0xff]  ;;  %v45_v25 = vld [vmem:[%s3115_s0 + $0xc0] sm:$0xff]  ;;  %v30_v26 = vld [vmem:[%s3115_s0 + $0x48] sm:$0xff] }
  0x13   :  { %2273 = vmatprep.mubr.msk.f32.mxu0 %vm64_vm0, %v27_v18  ;;  %2317 = vmatpush3.msra.mxu1 %v1930_v17  ;;  %v31_v27 = vld [vmem:[%s3115_s0 + $0x50] sm:$0xff]  ;;  %v46_v28 = vld [vmem:[%s3115_s0 + $0xc8] sm:$0xff]  ;;  %v32_v30 = vld [vmem:[%s3115_s0 + $0x58] sm:$0xff] }
  0x14   :  { %2295 = vmatmul.mubr.msk.f32.gmra.mxu1 %vm64_vm0, %v42_v19  ;;  %2318 = vmatprep.subr.mxu1 %v1929_v20  ;;  %v47_v29 = vld [vmem:[%s3115_s0 + $0xd0] sm:$0xff]  ;;  %v33_v31 = vld [vmem:[%s3115_s0 + $0x60] sm:$0xff]  ;;  %v48_v32 = vld [vmem:[%s3115_s0 + $0xd8] sm:$0xff] }
  0x15   :  { %2297 = vmatprep.mubr.msk.f32.mxu1 %vm64_vm0, %v43_v21  ;;  %2319 = vmatpush3.msra.mxu1 %v1929_v20  ;;  %v49_v33 = vld [vmem:[%s3115_s0 + $0xe0] sm:$0xff]  ;;  %v34_v34 = vld [vmem:[%s3115_s0 + $0x68] sm:$0xff]  ;;  %v35_v35 = vld [vmem:[%s3115_s0 + $0x70] sm:$0xff] }
  0x16   :  { %2274 = vmatmul.mubr.msk.f32.gmra.mxu0 %vm64_vm0, %v28_v22  ;;  %v50_v36 = vld [vmem:[%s3115_s0 + $0xe8] sm:$0xff]  ;;  %v51_v37 = vld [vmem:[%s3115_s0 + $0xf0] sm:$0xff]  ;;  %v36_v38 = vld [vmem:[%s3115_s0 + $0x78] sm:$0xff] }
  0x17   :  { %2276 = vmatprep.mubr.msk.f32.mxu0 %vm64_vm0, %v29_v23  ;;  %v52_v39 = vld [vmem:[%s3115_s0 + $0xf8] sm:$0xff]  ;;  %v1969_v41 = vld [vmem:[%s3116_s1 + $0x50] sm:$0xff]  ;;  %v1968_v42 = vld [vmem:[%s3116_s1 + $0x48] sm:$0xff] }
  0x18   :  { %2298 = vmatmul.mubr.msk.f32.gmra.mxu1 %vm64_vm0, %v44_v24  ;;  %v1970_v40 = vld [vmem:[%s3116_s1 + $0x58] sm:$0xff]  ;;  %v1967_v43 = vld [vmem:[%s3116_s1 + $0x40] sm:$0xff] }
  0x19   :  { %2300 = vmatprep.mubr.msk.f32.mxu1 %vm64_vm0, %v45_v25  ;;  %2368 = vmatprep.subr.mxu0 %v1970_v40  ;;  %v2769_v44 = vld [vmem:[%s3117_s2] ss:$0 sm:$0xff] }
  0x1a   :  { %2277 = vmatmul.mubr.msk.f32.gmra.mxu0 %vm64_vm0, %v30_v26 }
  0x1b   :  { %2279 = vmatprep.mubr.msk.f32.mxu0 %vm64_vm0, %v31_v27  ;;  %2369 = vmatpush3.msra.mxu0 %v1970_v40 }
  0x1c   :  { %2301 = vmatmul.mubr.msk.f32.gmra.mxu1 %vm64_vm0, %v46_v28  ;;  %2370 = vmatprep.subr.mxu0 %v1969_v41 }
  0x1d   :  { %2303 = vmatprep.mubr.msk.f32.mxu1 %vm64_vm0, %v47_v29  ;;  %2371 = vmatpush3.msra.mxu0 %v1969_v41 }
  0x1e   :  { %2280 = vmatmul.mubr.msk.f32.gmra.mxu0 %vm64_vm0, %v32_v30  ;;  %2372 = vmatprep.subr.mxu0 %v1968_v42 }
  0x1f   :  { %2282 = vmatprep.mubr.msk.f32.mxu0 %vm64_vm0, %v33_v31  ;;  %2373 = vmatpush3.msra.mxu0 %v1968_v42 }
  0x20   :  { %2304 = vmatmul.mubr.msk.f32.gmra.mxu1 %vm64_vm0, %v48_v32  ;;  %2374 = vmatprep.subr.mxu0 %v1967_v43 }
  0x21   :  { %2306 = vmatprep.mubr.msk.f32.mxu1 %vm64_vm0, %v49_v33  ;;  %2375 = vmatpush3.msra.mxu0 %v1967_v43 }
  0x22   :  { %2283 = vmatmul.mubr.msk.f32.gmra.mxu0 %vm64_vm0, %v34_v34 }
  0x23   :  { %2285 = vmatprep.mubr.msk.f32.mxu0 %vm64_vm0, %v35_v35 }
  0x24   :  { %2307 = vmatmul.mubr.msk.f32.gmra.mxu1 %vm64_vm0, %v50_v36 }
  0x25   :  { %2309 = vmatprep.mubr.msk.f32.mxu1 %vm64_vm0, %v51_v37 }
  0x26   :  { %2286 = vmatmul.mubr.msk.f32.gmra.mxu0 %vm64_vm0, %v36_v38 }
  0x28   :  { %2310 = vmatmul.mubr.msk.f32.gmra.mxu1 %vm64_vm0, %v52_v39 }
  0xca   :  { %v2266_v45 = vpop.f32.mrf.mxu0 }
  0xcb   :  { %v233_v46 = vadd.f32 %v2266_v45, %v2769_v44 }
  0xcc   :  { %v227_v47 = vpop.f32.mrf.mxu0  ;;  %v2772_v48 = vpop.f32.mrf.mxu1 }
  0xcd   :  { %v228_v49 = vadd.f32 %v2769_v44, %v227_v47  ;;  %v387_v53 = vmax.f32 %v233_v46, 0.0  ;;  %v313_v42 = vadd.f32 %v2772_v48, %v2769_v44 }
  0xce   :  { %v2269_v50 = vpop.f32.mrf.mxu0  ;;  %v307_v51 = vpop.f32.mrf.mxu1 }
  0xcf   :  { %v386_v52 = vmax.f32 %v228_v49, 0.0  ;;  %v243_v54 = vadd.f32 %v2269_v50, %v2769_v44  ;;  %v308_v32 = vadd.f32 %v2769_v44, %v307_v51  ;;  %v403_v47 = vmax.f32 %v313_v42, 0.0 }
  0xd0   :  { %v237_v55 = vpop.f32.mrf.mxu0  ;;  %v2776_v56 = vpop.f32.mrf.mxu1 }
  0xd1   :  { %v238_v57 = vadd.f32 %v2769_v44, %v237_v55  ;;  %2320 = vmatprep.mubr.msk.f32.mxu1 %vm64_vm0, %v386_v52  ;;  %v389_v61 = vmax.f32 %v243_v54, 0.0  ;;  %v402_v39 = vmax.f32 %v308_v32, 0.0  ;;  %v323_v49 = vadd.f32 %v2776_v56, %v2769_v44 }
  0xd2   :  { %v2272_v58 = vpop.f32.mrf.mxu0  ;;  %2321 = vmatmul.mubr.msk.f32.vlgmr.msra.gmra.mxu1 %vm64_vm0, %v387_v53  ;;  %v317_v59 = vpop.f32.mrf.mxu1 }
  0xd3   :  { %v388_v60 = vmax.f32 %v238_v57, 0.0  ;;  %v253_v62 = vadd.f32 %v2272_v58, %v2769_v44  ;;  %v318_v40 = vadd.f32 %v2769_v44, %v317_v59  ;;  %v405_v52 = vmax.f32 %v323_v49, 0.0 }
  0xd4   :  { %v247_v63 = vpop.f32.mrf.mxu0  ;;  %v2782_v0 = vpop.f32.mrf.mxu1 }
  0xd5   :  { %v248_v1 = vadd.f32 %v2769_v44, %v247_v63  ;;  %2323 = vmatprep.mubr.msk.f32.mxu1 %vm64_vm0, %v388_v60  ;;  %v391_v4 = vmax.f32 %v253_v62, 0.0  ;;  %v404_v45 = vmax.f32 %v318_v40, 0.0  ;;  %v333_v53 = vadd.f32 %v2782_v0, %v2769_v44 }
  0xd6   :  { %v2275_v2 = vpop.f32.mrf.mxu0  ;;  %2324 = vmatmul.mubr.msk.f32.gmra.mxu1 %vm64_vm0, %v389_v61  ;;  %v327_v7 = vpop.f32.mrf.mxu1 }
  0xd7   :  { %v390_v3 = vmax.f32 %v248_v1, 0.0  ;;  %v263_v5 = vadd.f32 %v2275_v2, %v2769_v44  ;;  %v328_v46 = vadd.f32 %v2769_v44, %v327_v7  ;;  %v407_v57 = vmax.f32 %v333_v53, 0.0 }
  0xd8   :  { %v257_v6 = vpop.f32.mrf.mxu0  ;;  %v2299_v14 = vpop.f32.mrf.mxu1 }
  0xd9   :  { %v258_v8 = vadd.f32 %v2769_v44, %v257_v6  ;;  %2326 = vmatprep.mubr.msk.f32.mxu1 %vm64_vm0, %v390_v3  ;;  %v393_v11 = vmax.f32 %v263_v5, 0.0  ;;  %v406_v51 = vmax.f32 %v328_v46, 0.0  ;;  %v343_v58 = vadd.f32 %v2299_v14, %v2769_v44  ;;  %v2008_v14 = vld [vmem:[%s3116_s1 + $0x78] sm:$0xff] }
  0xda   :  { %v2278_v9 = vpop.f32.mrf.mxu0  ;;  %2327 = vmatmul.mubr.msk.f32.gmra.mxu1 %vm64_vm0, %v391_v4  ;;  %v337_v21 = vpop.f32.mrf.mxu1  ;;  %2424 = vmatprep.subr.mxu1 %v2008_v14 }
  0xdb   :  { %v392_v10 = vmax.f32 %v258_v8, 0.0  ;;  %v273_v12 = vadd.f32 %v2278_v9, %v2769_v44  ;;  %v338_v48 = vadd.f32 %v2769_v44, %v337_v21  ;;  %v409_v62 = vmax.f32 %v343_v58, 0.0  ;;  %2425 = vmatpush3.msra.mxu1 %v2008_v14 }
  0xdc   :  { %v267_v13 = vpop.f32.mrf.mxu0  ;;  %v2302_v28 = vpop.f32.mrf.mxu1 }
  0xdd   :  { %v268_v15 = vadd.f32 %v2769_v44, %v267_v13  ;;  %2329 = vmatprep.mubr.msk.f32.mxu1 %vm64_vm0, %v392_v10  ;;  %v395_v18 = vmax.f32 %v273_v12, 0.0  ;;  %v408_v55 = vmax.f32 %v338_v48, 0.0  ;;  %v353_v63 = vadd.f32 %v2302_v28, %v2769_v44 }
  0xde   :  { %v2281_v16 = vpop.f32.mrf.mxu0  ;;  %2330 = vmatmul.mubr.msk.f32.gmra.mxu1 %vm64_vm0, %v393_v11  ;;  %v347_v36 = vpop.f32.mrf.mxu1 }
  0xdf   :  { %v394_v17 = vmax.f32 %v268_v15, 0.0  ;;  %v283_v19 = vadd.f32 %v2281_v16, %v2769_v44  ;;  %v348_v56 = vadd.f32 %v2769_v44, %v347_v36  ;;  %v411_v3 = vmax.f32 %v353_v63, 0.0  ;;  %v2007_v15 = vld [vmem:[%s3116_s1 + $0x70] sm:$0xff]  ;;  %v2005_v16 = vld [vmem:[%s3116_s1 + $0x60] sm:$0xff] }
  0xe0   :  { %v277_v20 = vpop.f32.mrf.mxu0  ;;  %v2305_v43 = vpop.f32.mrf.mxu1  ;;  %2426 = vmatprep.subr.mxu1 %v2007_v15 }
  0xe1   :  { %v278_v22 = vadd.f32 %v2769_v44, %v277_v20  ;;  %2332 = vmatprep.mubr.msk.f32.mxu1 %vm64_vm0, %v394_v17  ;;  %v397_v25 = vmax.f32 %v283_v19, 0.0  ;;  %v410_v60 = vmax.f32 %v348_v56, 0.0  ;;  %v363_v4 = vadd.f32 %v2305_v43, %v2769_v44  ;;  %2427 = vmatpush3.msra.mxu1 %v2007_v15  ;;  %v2859_v17 = vld [vmem:[%s3117_s2 + $0x1] ss:$0 sm:$0xff] }
  0xe2   :  { %v2284_v23 = vpop.f32.mrf.mxu0  ;;  %2333 = vmatmul.mubr.msk.f32.gmra.mxu1 %vm64_vm0, %v395_v18  ;;  %v357_v50 = vpop.f32.mrf.mxu1 }
  0xe3   :  { %v396_v24 = vmax.f32 %v278_v22, 0.0  ;;  %v293_v26 = vadd.f32 %v2284_v23, %v2769_v44  ;;  %v358_v61 = vadd.f32 %v2769_v44, %v357_v50  ;;  %v413_v8 = vmax.f32 %v363_v4, 0.0 }
  0xe4   :  { %v287_v27 = vpop.f32.mrf.mxu0  ;;  %v2308_v54 = vpop.f32.mrf.mxu1 }
  0xe5   :  { %v288_v29 = vadd.f32 %v2769_v44, %v287_v27  ;;  %2335 = vmatprep.mubr.msk.f32.mxu1 %vm64_vm0, %v396_v24  ;;  %v399_v33 = vmax.f32 %v293_v26, 0.0  ;;  %v412_v1 = vmax.f32 %v358_v61, 0.0  ;;  %v373_v9 = vadd.f32 %v2308_v54, %v2769_v44 }
  0xe6   :  { %v2287_v30 = vpop.f32.mrf.mxu0  ;;  %2336 = vmatmul.mubr.msk.f32.gmra.mxu1 %vm64_vm0, %v397_v25  ;;  %v367_v59 = vpop.f32.mrf.mxu1 }
  0xe7   :  { %v398_v31 = vmax.f32 %v288_v29, 0.0  ;;  %v303_v34 = vadd.f32 %v2287_v30, %v2769_v44  ;;  %v368_v2 = vadd.f32 %v2769_v44, %v367_v59  ;;  %v415_v11 = vmax.f32 %v373_v9, 0.0 }
  0xe8   :  { %v297_v35 = vpop.f32.mrf.mxu0  ;;  %v2311_v0 = vpop.f32.mrf.mxu1 }
  0xe9   :  { %v298_v37 = vadd.f32 %v2769_v44, %v297_v35  ;;  %2338 = vmatprep.mubr.msk.f32.mxu1 %vm64_vm0, %v398_v31  ;;  %v401_v41 = vmax.f32 %v303_v34, 0.0  ;;  %v414_v6 = vmax.f32 %v368_v2, 0.0  ;;  %v383_v12 = vadd.f32 %v2311_v0, %v2769_v44 }
  0xea   :  { %2339 = vmatmul.mubr.msk.f32.gmra.mxu1 %vm64_vm0, %v399_v33  ;;  %v377_v5 = vpop.f32.mrf.mxu1 }
  0xeb   :  { %v400_v38 = vmax.f32 %v298_v37, 0.0  ;;  %v378_v7 = vadd.f32 %v2769_v44, %v377_v5  ;;  %v417_v13 = vmax.f32 %v383_v12, 0.0  ;;  %v2006_v44 = vld [vmem:[%s3116_s1 + $0x68] sm:$0xff] }
  0xec   :  { %2428 = vmatprep.subr.mxu1 %v2006_v44 }
  0xed   :  { %2341 = vmatprep.mubr.msk.f32.mxu1 %vm64_vm0, %v400_v38  ;;  %v416_v10 = vmax.f32 %v378_v7, 0.0  ;;  %2429 = vmatpush3.msra.mxu1 %v2006_v44 }
  0xee   :  { %2342 = vmatmul.mubr.msk.f32.gmra.mxu1 %vm64_vm0, %v401_v41  ;;  %2430 = vmatprep.subr.mxu1 %v2005_v16 }
  0xef   :  { %2344 = vmatprep.mubr.msk.f32.mxu1 %vm64_vm0, %v402_v39  ;;  %2431 = vmatpush3.msra.mxu1 %v2005_v16 }
  0xf2   :  { %2345 = vmatmul.mubr.msk.f32.gmra.mxu1 %vm64_vm0, %v403_v47 }
  0xf3   :  { %2347 = vmatprep.mubr.msk.f32.mxu1 %vm64_vm0, %v404_v45 }
  0xf6   :  { %2348 = vmatmul.mubr.msk.f32.gmra.mxu1 %vm64_vm0, %v405_v52 }
  0xf7   :  { %2350 = vmatprep.mubr.msk.f32.mxu1 %vm64_vm0, %v406_v51 }
  0xfa   :  { %2351 = vmatmul.mubr.msk.f32.gmra.mxu1 %vm64_vm0, %v407_v57 }
  0xfb   :  { %2353 = vmatprep.mubr.msk.f32.mxu1 %vm64_vm0, %v408_v55 }
  0xfe   :  { %2354 = vmatmul.mubr.msk.f32.gmra.mxu1 %vm64_vm0, %v409_v62 }
  0xff   :  { %2356 = vmatprep.mubr.msk.f32.mxu1 %vm64_vm0, %v410_v60 }
 0x102   :  { %2357 = vmatmul.mubr.msk.f32.gmra.mxu1 %vm64_vm0, %v411_v3 }
 0x103   :  { %2359 = vmatprep.mubr.msk.f32.mxu1 %vm64_vm0, %v412_v1 }
 0x106   :  { %2360 = vmatmul.mubr.msk.f32.gmra.mxu1 %vm64_vm0, %v413_v8 }
 0x107   :  { %2362 = vmatprep.mubr.msk.f32.mxu1 %vm64_vm0, %v414_v6 }
 0x10a   :  { %2363 = vmatmul.mubr.msk.f32.gmra.mxu1 %vm64_vm0, %v415_v11 }
 0x10b   :  { %2365 = vmatprep.mubr.msk.f32.mxu1 %vm64_vm0, %v416_v10 }
 0x10e   :  { %2366 = vmatmul.mubr.msk.f32.gmra.mxu1 %vm64_vm0, %v417_v13 }
 0x192   :  { %v2322_v18 = vpop.f32.mrf.mxu1 }
 0x193   :  { %v599_v19 = vadd.f32 %v2322_v18, %v2859_v17 }
 0x194   :  { %v593_v20 = vpop.f32.mrf.mxu1 }
 0x195   :  { %v594_v21 = vadd.f32 %v2859_v17, %v593_v20  ;;  %v753_v24 = vmax.f32 %v599_v19, 0.0 }
 0x196   :  { %v2325_v22 = vpop.f32.mrf.mxu1 }
 0x197   :  { %v752_v23 = vmax.f32 %v594_v21, 0.0  ;;  %v609_v25 = vadd.f32 %v2325_v22, %v2859_v17 }
 0x198   :  { %v603_v26 = vpop.f32.mrf.mxu1 }
 0x199   :  { %v604_v27 = vadd.f32 %v2859_v17, %v603_v26  ;;  %2376 = vmatprep.mubr.msk.f32.mxu0 %vm64_vm0, %v752_v23  ;;  %v755_v30 = vmax.f32 %v609_v25, 0.0 }
 0x19a   :  { %v2328_v28 = vpop.f32.mrf.mxu1  ;;  %2377 = vmatmul.mubr.msk.f32.vlgmr.msra.gmra.mxu0 %vm64_vm0, %v753_v24 }
 0x19b   :  { %v754_v29 = vmax.f32 %v604_v27, 0.0  ;;  %v619_v31 = vadd.f32 %v2328_v28, %v2859_v17 }
 0x19c   :  { %v613_v32 = vpop.f32.mrf.mxu1 }
 0x19d   :  { %v614_v33 = vadd.f32 %v2859_v17, %v613_v32  ;;  %2379 = vmatprep.mubr.msk.f32.mxu0 %vm64_vm0, %v754_v29  ;;  %v757_v36 = vmax.f32 %v619_v31, 0.0 }
 0x19e   :  { %v2331_v34 = vpop.f32.mrf.mxu1  ;;  %2380 = vmatmul.mubr.msk.f32.gmra.mxu0 %vm64_vm0, %v755_v30 }
 0x19f   :  { %v756_v35 = vmax.f32 %v614_v33, 0.0  ;;  %v629_v37 = vadd.f32 %v2331_v34, %v2859_v17 }
 0x1a0   :  { %v623_v38 = vpop.f32.mrf.mxu1 }
 0x1a1   :  { %v624_v39 = vadd.f32 %v2859_v17, %v623_v38  ;;  %2382 = vmatprep.mubr.msk.f32.mxu0 %vm64_vm0, %v756_v35  ;;  %v759_v42 = vmax.f32 %v629_v37, 0.0 }
 0x1a2   :  { %v2334_v40 = vpop.f32.mrf.mxu1  ;;  %2383 = vmatmul.mubr.msk.f32.gmra.mxu0 %vm64_vm0, %v757_v36 }
 0x1a3   :  { %v758_v41 = vmax.f32 %v624_v39, 0.0  ;;  %v639_v43 = vadd.f32 %v2334_v40, %v2859_v17 }
 0x1a4   :  { %v633_v45 = vpop.f32.mrf.mxu1 }
 0x1a5   :  { %v634_v46 = vadd.f32 %v2859_v17, %v633_v45  ;;  %2385 = vmatprep.mubr.msk.f32.mxu0 %vm64_vm0, %v758_v41  ;;  %v761_v50 = vmax.f32 %v639_v43, 0.0 }
 0x1a6   :  { %v2337_v47 = vpop.f32.mrf.mxu1  ;;  %2386 = vmatmul.mubr.msk.f32.gmra.mxu0 %vm64_vm0, %v759_v42 }
 0x1a7   :  { %v760_v49 = vmax.f32 %v634_v46, 0.0  ;;  %v649_v51 = vadd.f32 %v2337_v47, %v2859_v17 }
 0x1a8   :  { %v643_v48 = vpop.f32.mrf.mxu1 }
 0x1a9   :  { %v644_v52 = vadd.f32 %v2859_v17, %v643_v48  ;;  %2388 = vmatprep.mubr.msk.f32.mxu0 %vm64_vm0, %v760_v49  ;;  %v763_v55 = vmax.f32 %v649_v51, 0.0 }
 0x1aa   :  { %v2340_v53 = vpop.f32.mrf.mxu1  ;;  %2389 = vmatmul.mubr.msk.f32.gmra.mxu0 %vm64_vm0, %v761_v50 }
 0x1ab   :  { %v762_v54 = vmax.f32 %v644_v52, 0.0  ;;  %v659_v56 = vadd.f32 %v2340_v53, %v2859_v17  ;;  %v1519_v52 = vld [vmem:[%s3118_s3 + $0x18] sm:$0xff]  ;;  %v1518_v53 = vld [vmem:[%s3118_s3 + $0x10] sm:$0xff] }
 0x1ac   :  { %v653_v57 = vpop.f32.mrf.mxu1  ;;  %2480 = vmatprep.subr.mxu0 %v1519_v52 }
 0x1ad   :  { %v654_v58 = vadd.f32 %v2859_v17, %v653_v57  ;;  %2391 = vmatprep.mubr.msk.f32.mxu0 %vm64_vm0, %v762_v54  ;;  %v765_v61 = vmax.f32 %v659_v56, 0.0  ;;  %2481 = vmatpush3.msra.mxu0 %v1519_v52  ;;  %v1516_v54 = vld [vmem:[%s3118_s3] sm:$0xff] }
 0x1ae   :  { %v2343_v59 = vpop.f32.mrf.mxu1  ;;  %2392 = vmatmul.mubr.msk.f32.gmra.mxu0 %vm64_vm0, %v763_v55  ;;  %2482 = vmatprep.subr.mxu0 %v1518_v53  ;;  %v2940_v55 = vld [vmem:[%s3117_s2 + $0x2] ss:$0 sm:$0xff] }
 0x1af   :  { %v764_v60 = vmax.f32 %v654_v58, 0.0  ;;  %v669_v62 = vadd.f32 %v2343_v59, %v2859_v17  ;;  %2483 = vmatpush3.msra.mxu0 %v1518_v53 }
 0x1b0   :  { %v663_v63 = vpop.f32.mrf.mxu1 }
 0x1b1   :  { %v664_v0 = vadd.f32 %v2859_v17, %v663_v63  ;;  %2394 = vmatprep.mubr.msk.f32.mxu0 %vm64_vm0, %v764_v60  ;;  %v767_v3 = vmax.f32 %v669_v62, 0.0 }
 0x1b2   :  { %v2346_v1 = vpop.f32.mrf.mxu1  ;;  %2395 = vmatmul.mubr.msk.f32.gmra.mxu0 %vm64_vm0, %v765_v61 }
 0x1b3   :  { %v766_v2 = vmax.f32 %v664_v0, 0.0  ;;  %v679_v4 = vadd.f32 %v2346_v1, %v2859_v17 }
 0x1b4   :  { %v673_v5 = vpop.f32.mrf.mxu1 }
 0x1b5   :  { %v674_v6 = vadd.f32 %v2859_v17, %v673_v5  ;;  %2397 = vmatprep.mubr.msk.f32.mxu0 %vm64_vm0, %v766_v2  ;;  %v769_v9 = vmax.f32 %v679_v4, 0.0 }
 0x1b6   :  { %v2349_v7 = vpop.f32.mrf.mxu1  ;;  %2398 = vmatmul.mubr.msk.f32.gmra.mxu0 %vm64_vm0, %v767_v3 }
 0x1b7   :  { %v768_v8 = vmax.f32 %v674_v6, 0.0  ;;  %v689_v10 = vadd.f32 %v2349_v7, %v2859_v17 }
 0x1b8   :  { %v683_v11 = vpop.f32.mrf.mxu1 }
 0x1b9   :  { %v684_v12 = vadd.f32 %v2859_v17, %v683_v11  ;;  %2400 = vmatprep.mubr.msk.f32.mxu0 %vm64_vm0, %v768_v8  ;;  %v771_v15 = vmax.f32 %v689_v10, 0.0 }
 0x1ba   :  { %v2352_v13 = vpop.f32.mrf.mxu1  ;;  %2401 = vmatmul.mubr.msk.f32.gmra.mxu0 %vm64_vm0, %v769_v9 }
 0x1bb   :  { %v770_v14 = vmax.f32 %v684_v12, 0.0  ;;  %v699_v44 = vadd.f32 %v2352_v13, %v2859_v17 }
 0x1bc   :  { %v693_v16 = vpop.f32.mrf.mxu1 }
 0x1bd   :  { %v694_v18 = vadd.f32 %v2859_v17, %v693_v16  ;;  %2403 = vmatprep.mubr.msk.f32.mxu0 %vm64_vm0, %v770_v14  ;;  %v773_v21 = vmax.f32 %v699_v44, 0.0 }
 0x1be   :  { %v2355_v19 = vpop.f32.mrf.mxu1  ;;  %2404 = vmatmul.mubr.msk.f32.gmra.mxu0 %vm64_vm0, %v771_v15 }
 0x1bf   :  { %v772_v20 = vmax.f32 %v694_v18, 0.0  ;;  %v709_v22 = vadd.f32 %v2355_v19, %v2859_v17 }
 0x1c0   :  { %v703_v23 = vpop.f32.mrf.mxu1 }
 0x1c1   :  { %v704_v24 = vadd.f32 %v2859_v17, %v703_v23  ;;  %2406 = vmatprep.mubr.msk.f32.mxu0 %vm64_vm0, %v772_v20  ;;  %v775_v27 = vmax.f32 %v709_v22, 0.0 }
 0x1c2   :  { %v2358_v25 = vpop.f32.mrf.mxu1  ;;  %2407 = vmatmul.mubr.msk.f32.gmra.mxu0 %vm64_vm0, %v773_v21 }
 0x1c3   :  { %v774_v26 = vmax.f32 %v704_v24, 0.0  ;;  %v719_v28 = vadd.f32 %v2358_v25, %v2859_v17 }
 0x1c4   :  { %v713_v29 = vpop.f32.mrf.mxu1 }
 0x1c5   :  { %v714_v30 = vadd.f32 %v2859_v17, %v713_v29  ;;  %2409 = vmatprep.mubr.msk.f32.mxu0 %vm64_vm0, %v774_v26  ;;  %v777_v33 = vmax.f32 %v719_v28, 0.0 }
 0x1c6   :  { %v2361_v31 = vpop.f32.mrf.mxu1  ;;  %2410 = vmatmul.mubr.msk.f32.gmra.mxu0 %vm64_vm0, %v775_v27 }
 0x1c7   :  { %v776_v32 = vmax.f32 %v714_v30, 0.0  ;;  %v729_v34 = vadd.f32 %v2361_v31, %v2859_v17 }
 0x1c8   :  { %v723_v35 = vpop.f32.mrf.mxu1 }
 0x1c9   :  { %v724_v36 = vadd.f32 %v2859_v17, %v723_v35  ;;  %2412 = vmatprep.mubr.msk.f32.mxu0 %vm64_vm0, %v776_v32  ;;  %v779_v39 = vmax.f32 %v729_v34, 0.0 }
 0x1ca   :  { %v2364_v37 = vpop.f32.mrf.mxu1  ;;  %2413 = vmatmul.mubr.msk.f32.gmra.mxu0 %vm64_vm0, %v777_v33 }
 0x1cb   :  { %v778_v38 = vmax.f32 %v724_v36, 0.0  ;;  %v739_v40 = vadd.f32 %v2364_v37, %v2859_v17 }
 0x1cc   :  { %v733_v41 = vpop.f32.mrf.mxu1 }
 0x1cd   :  { %v734_v42 = vadd.f32 %v2859_v17, %v733_v41  ;;  %2415 = vmatprep.mubr.msk.f32.mxu0 %vm64_vm0, %v778_v38  ;;  %v781_v46 = vmax.f32 %v739_v40, 0.0 }
 0x1ce   :  { %v2367_v43 = vpop.f32.mrf.mxu1  ;;  %2416 = vmatmul.mubr.msk.f32.gmra.mxu0 %vm64_vm0, %v779_v39 }
 0x1cf   :  { %v780_v45 = vmax.f32 %v734_v42, 0.0  ;;  %v749_v47 = vadd.f32 %v2367_v43, %v2859_v17 }
 0x1d0   :  { %v743_v49 = vpop.f32.mrf.mxu1 }
 0x1d1   :  { %v744_v50 = vadd.f32 %v2859_v17, %v743_v49  ;;  %2418 = vmatprep.mubr.msk.f32.mxu0 %vm64_vm0, %v780_v45  ;;  %v783_v48 = vmax.f32 %v749_v47, 0.0  ;;  %v1517_v17 = vld [vmem:[%s3118_s3 + $0x8] sm:$0xff] }
 0x1d2   :  { %2419 = vmatmul.mubr.msk.f32.gmra.mxu0 %vm64_vm0, %v781_v46  ;;  %2484 = vmatprep.subr.mxu0 %v1517_v17 }
 0x1d3   :  { %v782_v51 = vmax.f32 %v744_v50, 0.0  ;;  %2485 = vmatpush3.msra.mxu0 %v1517_v17 }
 0x1d4   :  { %2486 = vmatprep.subr.mxu0 %v1516_v54 }
 0x1d5   :  { %2421 = vmatprep.mubr.msk.f32.mxu0 %vm64_vm0, %v782_v51  ;;  %2487 = vmatpush3.msra.mxu0 %v1516_v54 }
 0x1d6   :  { %2422 = vmatmul.mubr.msk.f32.gmra.mxu0 %vm64_vm0, %v783_v48 }
 0x25a   :  { %v2378_v56 = vpop.f32.mrf.mxu0 }
 0x25b   :  { %v965_v57 = vadd.f32 %v2378_v56, %v2940_v55 }
 0x25c   :  { %v959_v58 = vpop.f32.mrf.mxu0 }
 0x25d   :  { %v960_v59 = vadd.f32 %v2940_v55, %v959_v58  ;;  %v1119_v62 = vmax.f32 %v965_v57, 0.0 }
 0x25e   :  { %v2381_v60 = vpop.f32.mrf.mxu0 }
 0x25f   :  { %v1118_v61 = vmax.f32 %v960_v59, 0.0  ;;  %v975_v63 = vadd.f32 %v2381_v60, %v2940_v55 }
 0x260   :  { %v969_v0 = vpop.f32.mrf.mxu0 }
 0x261   :  { %v970_v1 = vadd.f32 %v2940_v55, %v969_v0  ;;  %2432 = vmatprep.mubr.msk.f32.mxu1 %vm64_vm0, %v1118_v61  ;;  %v1121_v4 = vmax.f32 %v975_v63, 0.0 }
 0x262   :  { %v2384_v2 = vpop.f32.mrf.mxu0  ;;  %2433 = vmatmul.mubr.msk.f32.vlgmr.msra.gmra.mxu1 %vm64_vm0, %v1119_v62 }
 0x263   :  { %v1120_v3 = vmax.f32 %v970_v1, 0.0  ;;  %v985_v5 = vadd.f32 %v2384_v2, %v2940_v55 }
 0x264   :  { %v979_v6 = vpop.f32.mrf.mxu0 }
 0x265   :  { %v980_v7 = vadd.f32 %v2940_v55, %v979_v6  ;;  %2435 = vmatprep.mubr.msk.f32.mxu1 %vm64_vm0, %v1120_v3  ;;  %v1123_v10 = vmax.f32 %v985_v5, 0.0 }
 0x266   :  { %v2387_v8 = vpop.f32.mrf.mxu0  ;;  %2436 = vmatmul.mubr.msk.f32.gmra.mxu1 %vm64_vm0, %v1121_v4 }
 0x267   :  { %v1122_v9 = vmax.f32 %v980_v7, 0.0  ;;  %v995_v11 = vadd.f32 %v2387_v8, %v2940_v55 }
 0x268   :  { %v989_v12 = vpop.f32.mrf.mxu0 }
 0x269   :  { %v990_v13 = vadd.f32 %v2940_v55, %v989_v12  ;;  %2438 = vmatprep.mubr.msk.f32.mxu1 %vm64_vm0, %v1122_v9  ;;  %v1125_v44 = vmax.f32 %v995_v11, 0.0 }
 0x26a   :  { %v2390_v14 = vpop.f32.mrf.mxu0  ;;  %2439 = vmatmul.mubr.msk.f32.gmra.mxu1 %vm64_vm0, %v1123_v10 }
 0x26b   :  { %v1124_v15 = vmax.f32 %v990_v13, 0.0  ;;  %v1005_v16 = vadd.f32 %v2390_v14, %v2940_v55 }
 0x26c   :  { %v999_v18 = vpop.f32.mrf.mxu0 }
 0x26d   :  { %v1000_v19 = vadd.f32 %v2940_v55, %v999_v18  ;;  %2441 = vmatprep.mubr.msk.f32.mxu1 %vm64_vm0, %v1124_v15  ;;  %v1127_v22 = vmax.f32 %v1005_v16, 0.0 }
 0x26e   :  { %v2393_v20 = vpop.f32.mrf.mxu0  ;;  %2442 = vmatmul.mubr.msk.f32.gmra.mxu1 %vm64_vm0, %v1125_v44 }
 0x26f   :  { %v1126_v21 = vmax.f32 %v1000_v19, 0.0  ;;  %v1015_v23 = vadd.f32 %v2393_v20, %v2940_v55 }
 0x270   :  { %v1009_v24 = vpop.f32.mrf.mxu0 }
 0x271   :  { %v1010_v25 = vadd.f32 %v2940_v55, %v1009_v24  ;;  %2444 = vmatprep.mubr.msk.f32.mxu1 %vm64_vm0, %v1126_v21  ;;  %v1129_v28 = vmax.f32 %v1015_v23, 0.0 }
 0x272   :  { %v2396_v26 = vpop.f32.mrf.mxu0  ;;  %2445 = vmatmul.mubr.msk.f32.gmra.mxu1 %vm64_vm0, %v1127_v22 }
 0x273   :  { %v1128_v27 = vmax.f32 %v1010_v25, 0.0  ;;  %v1025_v29 = vadd.f32 %v2396_v26, %v2940_v55  ;;  %v3009_v25 = vld [vmem:[%s3117_s2 + $0x3] ss:$0 sm:$0xff] }
 0x274   :  { %v1019_v30 = vpop.f32.mrf.mxu0 }
 0x275   :  { %v1020_v31 = vadd.f32 %v2940_v55, %v1019_v30  ;;  %2447 = vmatprep.mubr.msk.f32.mxu1 %vm64_vm0, %v1128_v27  ;;  %v1131_v34 = vmax.f32 %v1025_v29, 0.0 }
 0x276   :  { %v2399_v32 = vpop.f32.mrf.mxu0  ;;  %2448 = vmatmul.mubr.msk.f32.gmra.mxu1 %vm64_vm0, %v1129_v28 }
 0x277   :  { %v1130_v33 = vmax.f32 %v1020_v31, 0.0  ;;  %v1035_v35 = vadd.f32 %v2399_v32, %v2940_v55 }
 0x278   :  { %v1029_v36 = vpop.f32.mrf.mxu0 }
 0x279   :  { %v1030_v37 = vadd.f32 %v2940_v55, %v1029_v36  ;;  %2450 = vmatprep.mubr.msk.f32.mxu1 %vm64_vm0, %v1130_v33  ;;  %v1133_v40 = vmax.f32 %v1035_v35, 0.0 }
 0x27a   :  { %v2402_v38 = vpop.f32.mrf.mxu0  ;;  %2451 = vmatmul.mubr.msk.f32.gmra.mxu1 %vm64_vm0, %v1131_v34 }
 0x27b   :  { %v1132_v39 = vmax.f32 %v1030_v37, 0.0  ;;  %v1045_v41 = vadd.f32 %v2402_v38, %v2940_v55 }
 0x27c   :  { %v1039_v42 = vpop.f32.mrf.mxu0 }
 0x27d   :  { %v1040_v43 = vadd.f32 %v2940_v55, %v1039_v42  ;;  %2453 = vmatprep.mubr.msk.f32.mxu1 %vm64_vm0, %v1132_v39  ;;  %v1135_v47 = vmax.f32 %v1045_v41, 0.0 }
 0x27e   :  { %v2405_v45 = vpop.f32.mrf.mxu0  ;;  %2454 = vmatmul.mubr.msk.f32.gmra.mxu1 %vm64_vm0, %v1133_v40 }
 0x27f   :  { %v1134_v46 = vmax.f32 %v1040_v43, 0.0  ;;  %v1055_v49 = vadd.f32 %v2405_v45, %v2940_v55 }
 0x280   :  { %v1049_v50 = vpop.f32.mrf.mxu0 }
 0x281   :  { %v1050_v51 = vadd.f32 %v2940_v55, %v1049_v50  ;;  %2456 = vmatprep.mubr.msk.f32.mxu1 %vm64_vm0, %v1134_v46  ;;  %v1137_v53 = vmax.f32 %v1055_v49, 0.0 }
 0x282   :  { %v2408_v48 = vpop.f32.mrf.mxu0  ;;  %2457 = vmatmul.mubr.msk.f32.gmra.mxu1 %vm64_vm0, %v1135_v47 }
 0x283   :  { %v1136_v52 = vmax.f32 %v1050_v51, 0.0  ;;  %v1065_v17 = vadd.f32 %v2408_v48, %v2940_v55 }
 0x284   :  { %v1059_v54 = vpop.f32.mrf.mxu0 }
 0x285   :  { %v1060_v56 = vadd.f32 %v2940_v55, %v1059_v54  ;;  %2459 = vmatprep.mubr.msk.f32.mxu1 %vm64_vm0, %v1136_v52  ;;  %v1139_v59 = vmax.f32 %v1065_v17, 0.0 }
 0x286   :  { %v2411_v57 = vpop.f32.mrf.mxu0  ;;  %2460 = vmatmul.mubr.msk.f32.gmra.mxu1 %vm64_vm0, %v1137_v53 }
 0x287   :  { %v1138_v58 = vmax.f32 %v1060_v56, 0.0  ;;  %v1075_v60 = vadd.f32 %v2411_v57, %v2940_v55 }
 0x288   :  { %v1069_v61 = vpop.f32.mrf.mxu0 }
 0x289   :  { %v1070_v62 = vadd.f32 %v2940_v55, %v1069_v61  ;;  %2462 = vmatprep.mubr.msk.f32.mxu1 %vm64_vm0, %v1138_v58  ;;  %v1141_v1 = vmax.f32 %v1075_v60, 0.0 }
 0x28a   :  { %v2414_v63 = vpop.f32.mrf.mxu0  ;;  %2463 = vmatmul.mubr.msk.f32.gmra.mxu1 %vm64_vm0, %v1139_v59 }
 0x28b   :  { %v1140_v0 = vmax.f32 %v1070_v62, 0.0  ;;  %v1085_v2 = vadd.f32 %v2414_v63, %v2940_v55 }
 0x28c   :  { %v1079_v3 = vpop.f32.mrf.mxu0 }
 0x28d   :  { %v1080_v4 = vadd.f32 %v2940_v55, %v1079_v3  ;;  %2465 = vmatprep.mubr.msk.f32.mxu1 %vm64_vm0, %v1140_v0  ;;  %v1143_v7 = vmax.f32 %v1085_v2, 0.0 }
 0x28e   :  { %v2417_v5 = vpop.f32.mrf.mxu0  ;;  %2466 = vmatmul.mubr.msk.f32.gmra.mxu1 %vm64_vm0, %v1141_v1 }
 0x28f   :  { %v1142_v6 = vmax.f32 %v1080_v4, 0.0  ;;  %v1095_v8 = vadd.f32 %v2417_v5, %v2940_v55 }
 0x290   :  { %v1089_v9 = vpop.f32.mrf.mxu0 }
 0x291   :  { %v1090_v10 = vadd.f32 %v2940_v55, %v1089_v9  ;;  %2468 = vmatprep.mubr.msk.f32.mxu1 %vm64_vm0, %v1142_v6  ;;  %v1145_v13 = vmax.f32 %v1095_v8, 0.0 }
 0x292   :  { %v2420_v11 = vpop.f32.mrf.mxu0  ;;  %2469 = vmatmul.mubr.msk.f32.gmra.mxu1 %vm64_vm0, %v1143_v7 }
 0x293   :  { %v1144_v12 = vmax.f32 %v1090_v10, 0.0  ;;  %v1105_v14 = vadd.f32 %v2420_v11, %v2940_v55 }
 0x294   :  { %v1099_v15 = vpop.f32.mrf.mxu0 }
 0x295   :  { %v1100_v44 = vadd.f32 %v2940_v55, %v1099_v15  ;;  %2471 = vmatprep.mubr.msk.f32.mxu1 %vm64_vm0, %v1144_v12  ;;  %v1147_v19 = vmax.f32 %v1105_v14, 0.0 }
 0x296   :  { %v2423_v16 = vpop.f32.mrf.mxu0  ;;  %2472 = vmatmul.mubr.msk.f32.gmra.mxu1 %vm64_vm0, %v1145_v13 }
 0x297   :  { %v1146_v18 = vmax.f32 %v1100_v44, 0.0  ;;  %v1115_v20 = vadd.f32 %v2423_v16, %v2940_v55 }
 0x298   :  { %v1109_v21 = vpop.f32.mrf.mxu0 }
 0x299   :  { %v1110_v22 = vadd.f32 %v2940_v55, %v1109_v21  ;;  %2474 = vmatprep.mubr.msk.f32.mxu1 %vm64_vm0, %v1146_v18  ;;  %v1149_v24 = vmax.f32 %v1115_v20, 0.0 }
 0x29a   :  { %2475 = vmatmul.mubr.msk.f32.gmra.mxu1 %vm64_vm0, %v1147_v19 }
 0x29b   :  { %v1148_v23 = vmax.f32 %v1110_v22, 0.0 }
 0x29d   :  { %2477 = vmatprep.mubr.msk.f32.mxu1 %vm64_vm0, %v1148_v23 }
 0x29e   :  { %2478 = vmatmul.mubr.msk.f32.gmra.mxu1 %vm64_vm0, %v1149_v24 }
 0x322   :  { %v2434_v26 = vpop.f32.mrf.mxu1 }
 0x323   :  { %v1331_v27 = vadd.f32 %v2434_v26, %v3009_v25 }
 0x324   :  { %v1325_v28 = vpop.f32.mrf.mxu1 }
 0x325   :  { %v1326_v55 = vadd.f32 %v3009_v25, %v1325_v28  ;;  %v1485_v31 = vmax.f32 %v1331_v27, 0.0 }
 0x326   :  { %v2437_v29 = vpop.f32.mrf.mxu1 }
 0x327   :  { %v1484_v30 = vmax.f32 %v1326_v55, 0.0  ;;  %v1341_v32 = vadd.f32 %v2437_v29, %v3009_v25 }
 0x328   :  { %v1335_v33 = vpop.f32.mrf.mxu1 }
 0x329   :  { %v1336_v34 = vadd.f32 %v3009_v25, %v1335_v33  ;;  %2488 = vmatprep.mubr.msk.f32.mxu0 %vm64_vm0, %v1484_v30  ;;  %v1487_v37 = vmax.f32 %v1341_v32, 0.0 }
 0x32a   :  { %v2440_v35 = vpop.f32.mrf.mxu1  ;;  %2489 = vmatmul.mubr.msk.f32.vlgmr.msra.gmra.mxu0 %vm64_vm0, %v1485_v31 }
 0x32b   :  { %v1486_v36 = vmax.f32 %v1336_v34, 0.0  ;;  %v1351_v38 = vadd.f32 %v2440_v35, %v3009_v25 }
 0x32c   :  { %v1345_v39 = vpop.f32.mrf.mxu1 }
 0x32d   :  { %v1346_v40 = vadd.f32 %v3009_v25, %v1345_v39  ;;  %2491 = vmatprep.mubr.msk.f32.mxu0 %vm64_vm0, %v1486_v36  ;;  %v1489_v43 = vmax.f32 %v1351_v38, 0.0 }
 0x32e   :  { %v2443_v41 = vpop.f32.mrf.mxu1  ;;  %2492 = vmatmul.mubr.msk.f32.gmra.mxu0 %vm64_vm0, %v1487_v37 }
 0x32f   :  { %v1488_v42 = vmax.f32 %v1346_v40, 0.0  ;;  %v1361_v45 = vadd.f32 %v2443_v41, %v3009_v25 }
 0x330   :  { %v1355_v46 = vpop.f32.mrf.mxu1 }
 0x331   :  { %v1356_v47 = vadd.f32 %v3009_v25, %v1355_v46  ;;  %2494 = vmatprep.mubr.msk.f32.mxu0 %vm64_vm0, %v1488_v42  ;;  %v1491_v51 = vmax.f32 %v1361_v45, 0.0 }
 0x332   :  { %v2446_v49 = vpop.f32.mrf.mxu1  ;;  %2495 = vmatmul.mubr.msk.f32.gmra.mxu0 %vm64_vm0, %v1489_v43 }
 0x333   :  { %v1490_v50 = vmax.f32 %v1356_v47, 0.0  ;;  %v1371_v48 = vadd.f32 %v2446_v49, %v3009_v25 }
 0x334   :  { %v1365_v52 = vpop.f32.mrf.mxu1 }
 0x335   :  { %v1366_v53 = vadd.f32 %v3009_v25, %v1365_v52  ;;  %2497 = vmatprep.mubr.msk.f32.mxu0 %vm64_vm0, %v1490_v50  ;;  %v1493_v56 = vmax.f32 %v1371_v48, 0.0 }
 0x336   :  { %v2449_v17 = vpop.f32.mrf.mxu1  ;;  %2498 = vmatmul.mubr.msk.f32.gmra.mxu0 %vm64_vm0, %v1491_v51 }
 0x337   :  { %v1492_v54 = vmax.f32 %v1366_v53, 0.0  ;;  %v1381_v57 = vadd.f32 %v2449_v17, %v3009_v25 }
 0x338   :  { %v1375_v58 = vpop.f32.mrf.mxu1 }
 0x339   :  { %v1376_v59 = vadd.f32 %v3009_v25, %v1375_v58  ;;  %2500 = vmatprep.mubr.msk.f32.mxu0 %vm64_vm0, %v1492_v54  ;;  %v1495_v62 = vmax.f32 %v1381_v57, 0.0 }
 0x33a   :  { %v2452_v60 = vpop.f32.mrf.mxu1  ;;  %2501 = vmatmul.mubr.msk.f32.gmra.mxu0 %vm64_vm0, %v1493_v56 }
 0x33b   :  { %v1494_v61 = vmax.f32 %v1376_v59, 0.0  ;;  %v1391_v63 = vadd.f32 %v2452_v60, %v3009_v25  ;;  %v3078_v59 = vld [vmem:[%s3119_s4] ss:$0 sm:$0xff]  ;;  %s2569_s4 = smov [#allocation2]  }
 0x33c   :  { %v1385_v0 = vpop.f32.mrf.mxu1  ;;  %s1885_s28 = sshll.u32 %s2569_s4, 4  ;;  %s1886_s28 = int_to_ptr.vmem [resolvable:$true] %s1885_s28 }
 0x33d   :  { %v1386_v1 = vadd.f32 %v3009_v25, %v1385_v0  ;;  %2503 = vmatprep.mubr.msk.f32.mxu0 %vm64_vm0, %v1494_v61  ;;  %v1497_v4 = vmax.f32 %v1391_v63, 0.0  ;;  %s2547_s0 = scalar_lea.vmem %s1886_s28, 4096  ;;  %p2552_p1 = scmp.lt.s32.totalorder %s1886_s28, %s1886_s28 }
 0x33e   :  { %v2455_v2 = vpop.f32.mrf.mxu1  ;;  %2504 = vmatmul.mubr.msk.f32.gmra.mxu0 %vm64_vm0, %v1495_v62  ;;  %p2548_p0 = scmp.ne.s32.totalorder %s1886_s28, %s2547_s0  ;;  %p2553_p2 = scmp.lt.s32.totalorder %s2547_s0, %s2547_s0 }
 0x33f   :  { %v1496_v3 = vmax.f32 %v1386_v1, 0.0  ;;  %v1401_v5 = vadd.f32 %v2455_v2, %v3009_v25 }
 0x340   :  { %v1395_v6 = vpop.f32.mrf.mxu1  ;;  %p2554_p3 = por %p2553_p2, %p2552_p1 }
 0x341   :  { %v1396_v7 = vadd.f32 %v3009_v25, %v1395_v6  ;;  %2506 = vmatprep.mubr.msk.f32.mxu0 %vm64_vm0, %v1496_v3  ;;  %v1499_v10 = vmax.f32 %v1401_v5, 0.0 }
 0x342   :  { %v2458_v8 = vpop.f32.mrf.mxu1  ;;  %2507 = vmatmul.mubr.msk.f32.gmra.mxu0 %vm64_vm0, %v1497_v4  ;;  %p2555_p4 = pnand %p2554_p3, %p2548_p0 }
 0x343   :  { %v1498_v9 = vmax.f32 %v1396_v7, 0.0  ;;  %v1411_v11 = vadd.f32 %v2458_v8, %v3009_v25 }
 0x344   :  { %v1405_v12 = vpop.f32.mrf.mxu1 }
 0x345   :  { %v1406_v13 = vadd.f32 %v3009_v25, %v1405_v12  ;;  %2509 = vmatprep.mubr.msk.f32.mxu0 %vm64_vm0, %v1498_v9  ;;  %v1501_v44 = vmax.f32 %v1411_v11, 0.0 }
 0x346   :  { %v2461_v14 = vpop.f32.mrf.mxu1  ;;  %2510 = vmatmul.mubr.msk.f32.gmra.mxu0 %vm64_vm0, %v1499_v10 }
 0x347   :  { %v1500_v15 = vmax.f32 %v1406_v13, 0.0  ;;  %v1421_v16 = vadd.f32 %v2461_v14, %v3009_v25 }
 0x348   :  { %v1415_v18 = vpop.f32.mrf.mxu1 }
 0x349   :  { %v1416_v19 = vadd.f32 %v3009_v25, %v1415_v18  ;;  %2512 = vmatprep.mubr.msk.f32.mxu0 %vm64_vm0, %v1500_v15  ;;  %v1503_v22 = vmax.f32 %v1421_v16, 0.0 }
 0x34a   :  { %v2464_v20 = vpop.f32.mrf.mxu1  ;;  %2513 = vmatmul.mubr.msk.f32.gmra.mxu0 %vm64_vm0, %v1501_v44 }
 0x34b   :  { %v1502_v21 = vmax.f32 %v1416_v19, 0.0  ;;  %v1431_v23 = vadd.f32 %v2464_v20, %v3009_v25 }
 0x34c   :  { %v1425_v24 = vpop.f32.mrf.mxu1 }
 0x34d   :  { %v1426_v26 = vadd.f32 %v3009_v25, %v1425_v24  ;;  %2515 = vmatprep.mubr.msk.f32.mxu0 %vm64_vm0, %v1502_v21  ;;  %v1505_v55 = vmax.f32 %v1431_v23, 0.0 }
 0x34e   :  { %v2467_v27 = vpop.f32.mrf.mxu1  ;;  %2516 = vmatmul.mubr.msk.f32.gmra.mxu0 %vm64_vm0, %v1503_v22 }
 0x34f   :  { %v1504_v28 = vmax.f32 %v1426_v26, 0.0  ;;  %v1441_v29 = vadd.f32 %v2467_v27, %v3009_v25 }
 0x350   :  { %v1435_v30 = vpop.f32.mrf.mxu1 }
 0x351   :  { %v1436_v31 = vadd.f32 %v3009_v25, %v1435_v30  ;;  %2518 = vmatprep.mubr.msk.f32.mxu0 %vm64_vm0, %v1504_v28  ;;  %v1507_v34 = vmax.f32 %v1441_v29, 0.0 }
 0x352   :  { %v2470_v32 = vpop.f32.mrf.mxu1  ;;  %2519 = vmatmul.mubr.msk.f32.gmra.mxu0 %vm64_vm0, %v1505_v55 }
 0x353   :  { %v1506_v33 = vmax.f32 %v1436_v31, 0.0  ;;  %v1451_v35 = vadd.f32 %v2470_v32, %v3009_v25 }
 0x354   :  { %v1445_v36 = vpop.f32.mrf.mxu1 }
 0x355   :  { %v1446_v37 = vadd.f32 %v3009_v25, %v1445_v36  ;;  %2521 = vmatprep.mubr.msk.f32.mxu0 %vm64_vm0, %v1506_v33  ;;  %v1509_v40 = vmax.f32 %v1451_v35, 0.0 }
 0x356   :  { %v2473_v38 = vpop.f32.mrf.mxu1  ;;  %2522 = vmatmul.mubr.msk.f32.gmra.mxu0 %vm64_vm0, %v1507_v34 }
 0x357   :  { %v1508_v39 = vmax.f32 %v1446_v37, 0.0  ;;  %v1461_v41 = vadd.f32 %v2473_v38, %v3009_v25 }
 0x358   :  { %v1455_v42 = vpop.f32.mrf.mxu1 }
 0x359   :  { %v1456_v43 = vadd.f32 %v3009_v25, %v1455_v42  ;;  %2524 = vmatprep.mubr.msk.f32.mxu0 %vm64_vm0, %v1508_v39  ;;  %v1511_v47 = vmax.f32 %v1461_v41, 0.0 }
 0x35a   :  { %v2476_v45 = vpop.f32.mrf.mxu1  ;;  %2525 = vmatmul.mubr.msk.f32.gmra.mxu0 %vm64_vm0, %v1509_v40 }
 0x35b   :  { %v1510_v46 = vmax.f32 %v1456_v43, 0.0  ;;  %v1471_v49 = vadd.f32 %v2476_v45, %v3009_v25 }
 0x35c   :  { %v1465_v50 = vpop.f32.mrf.mxu1 }
 0x35d   :  { %v1466_v51 = vadd.f32 %v3009_v25, %v1465_v50  ;;  %2527 = vmatprep.mubr.msk.f32.mxu0 %vm64_vm0, %v1510_v46  ;;  %v1513_v53 = vmax.f32 %v1471_v49, 0.0 }
 0x35e   :  { %v2479_v48 = vpop.f32.mrf.mxu1  ;;  %2528 = vmatmul.mubr.msk.f32.gmra.mxu0 %vm64_vm0, %v1511_v47 }
 0x35f   :  { %v1512_v52 = vmax.f32 %v1466_v51, 0.0  ;;  %v1481_v17 = vadd.f32 %v2479_v48, %v3009_v25 }
 0x360   :  { %v1475_v54 = vpop.f32.mrf.mxu1 }
 0x361   :  { %v1476_v56 = vadd.f32 %v3009_v25, %v1475_v54  ;;  %2530 = vmatprep.mubr.msk.f32.mxu0 %vm64_vm0, %v1512_v52  ;;  %v1515_v58 = vmax.f32 %v1481_v17, 0.0 }
 0x362   :  { %2531 = vmatmul.mubr.msk.f32.gmra.mxu0 %vm64_vm0, %v1513_v53 }
 0x363   :  { %v1514_v57 = vmax.f32 %v1476_v56, 0.0 }
 0x365   :  { %2533 = vmatprep.mubr.msk.f32.mxu0 %vm64_vm0, %v1514_v57 }
 0x366   :  { %2534 = vmatmul.mubr.msk.f32.gmra.mxu0 %vm64_vm0, %v1515_v58 }
 0x3ea   :  { %v2490_v60 = vpop.f32.mrf.mxu0 }
 0x3eb   :  { %v1695_v61 = vadd.f32 %v2490_v60, %v3078_v59 }
 0x3ec   :  { %v1689_v62 = vpop.f32.mrf.mxu0 }
 0x3ed   :  { %1849 = vst [vmem:[#allocation2 + $0x8] sm:$0xff] %v1695_v61  ;;  %v1690_v25 = vadd.f32 %v3078_v59, %v1689_v62 }
 0x3ee   :  { %v2493_v63 = vpop.f32.mrf.mxu0 }
 0x3ef   :  { %1848 = vst [vmem:[#allocation2] sm:$0xff] %v1690_v25  ;;  %v1705_v0 = vadd.f32 %v2493_v63, %v3078_v59 }
 0x3f0   :  { %v1699_v1 = vpop.f32.mrf.mxu0 }
 0x3f1   :  { %1851 = vst [vmem:[#allocation2 + $0x18] sm:$0xff] %v1705_v0  ;;  %v1700_v2 = vadd.f32 %v3078_v59, %v1699_v1 }
 0x3f2   :  { %v2496_v3 = vpop.f32.mrf.mxu0 }
 0x3f3   :  { %1850 = vst [vmem:[#allocation2 + $0x10] sm:$0xff] %v1700_v2  ;;  %v1715_v4 = vadd.f32 %v2496_v3, %v3078_v59 }
 0x3f4   :  { %v1709_v5 = vpop.f32.mrf.mxu0 }
 0x3f5   :  { %1853 = vst [vmem:[#allocation2 + $0x28] sm:$0xff] %v1715_v4  ;;  %v1710_v6 = vadd.f32 %v3078_v59, %v1709_v5 }
 0x3f6   :  { %v2499_v7 = vpop.f32.mrf.mxu0 }
 0x3f7   :  { %1852 = vst [vmem:[#allocation2 + $0x20] sm:$0xff] %v1710_v6  ;;  %v1725_v8 = vadd.f32 %v2499_v7, %v3078_v59 }
 0x3f8   :  { %v1719_v9 = vpop.f32.mrf.mxu0 }
 0x3f9   :  { %1855 = vst [vmem:[#allocation2 + $0x38] sm:$0xff] %v1725_v8  ;;  %v1720_v10 = vadd.f32 %v3078_v59, %v1719_v9 }
 0x3fa   :  { %v2502_v11 = vpop.f32.mrf.mxu0 }
 0x3fb   :  { %1854 = vst [vmem:[#allocation2 + $0x30] sm:$0xff] %v1720_v10  ;;  %v1735_v12 = vadd.f32 %v2502_v11, %v3078_v59 }
 0x3fc   :  { %v1729_v13 = vpop.f32.mrf.mxu0 }
 0x3fd   :  { %1857 = vst [vmem:[#allocation2 + $0x48] sm:$0xff] %v1735_v12  ;;  %v1730_v14 = vadd.f32 %v3078_v59, %v1729_v13 }
 0x3fe   :  { %v2505_v15 = vpop.f32.mrf.mxu0 }
 0x3ff   :  { %1856 = vst [vmem:[#allocation2 + $0x40] sm:$0xff] %v1730_v14  ;;  %v1745_v44 = vadd.f32 %v2505_v15, %v3078_v59 }
 0x400   :  { %v1739_v16 = vpop.f32.mrf.mxu0 }
 0x401   :  { %1859 = vst [vmem:[#allocation2 + $0x58] sm:$0xff] %v1745_v44  ;;  %v1740_v18 = vadd.f32 %v3078_v59, %v1739_v16 }
 0x402   :  { %v2508_v19 = vpop.f32.mrf.mxu0 }
 0x403   :  { %1858 = vst [vmem:[#allocation2 + $0x50] sm:$0xff] %v1740_v18  ;;  %v1755_v20 = vadd.f32 %v2508_v19, %v3078_v59 }
 0x404   :  { %v1749_v21 = vpop.f32.mrf.mxu0 }
 0x405   :  { %1861 = vst [vmem:[#allocation2 + $0x68] sm:$0xff] %v1755_v20  ;;  %v1750_v22 = vadd.f32 %v3078_v59, %v1749_v21 }
 0x406   :  { %v2511_v23 = vpop.f32.mrf.mxu0 }
 0x407   :  { %1860 = vst [vmem:[#allocation2 + $0x60] sm:$0xff] %v1750_v22  ;;  %v1765_v24 = vadd.f32 %v2511_v23, %v3078_v59 }
 0x408   :  { %v1759_v26 = vpop.f32.mrf.mxu0 }
 0x409   :  { %1863 = vst [vmem:[#allocation2 + $0x78] sm:$0xff] %v1765_v24  ;;  %v1760_v27 = vadd.f32 %v3078_v59, %v1759_v26 }
 0x40a   :  { %v2514_v28 = vpop.f32.mrf.mxu0 }
 0x40b   :  { %1862 = vst [vmem:[#allocation2 + $0x70] sm:$0xff] %v1760_v27  ;;  %v1775_v55 = vadd.f32 %v2514_v28, %v3078_v59 }
 0x40c   :  { %v1769_v29 = vpop.f32.mrf.mxu0 }
 0x40d   :  { %1865 = vst [vmem:[#allocation2 + $0x88] sm:$0xff] %v1775_v55  ;;  %v1770_v30 = vadd.f32 %v3078_v59, %v1769_v29 }
 0x40e   :  { %v2517_v31 = vpop.f32.mrf.mxu0 }
 0x40f   :  { %1864 = vst [vmem:[#allocation2 + $0x80] sm:$0xff] %v1770_v30  ;;  %v1785_v32 = vadd.f32 %v2517_v31, %v3078_v59 }
 0x410   :  { %v1779_v33 = vpop.f32.mrf.mxu0 }
 0x411   :  { %1867 = vst [vmem:[#allocation2 + $0x98] sm:$0xff] %v1785_v32  ;;  %v1780_v34 = vadd.f32 %v3078_v59, %v1779_v33 }
 0x412   :  { %v2520_v35 = vpop.f32.mrf.mxu0 }
 0x413   :  { %1866 = vst [vmem:[#allocation2 + $0x90] sm:$0xff] %v1780_v34  ;;  %v1795_v36 = vadd.f32 %v2520_v35, %v3078_v59 }
 0x414   :  { %v1789_v37 = vpop.f32.mrf.mxu0 }
 0x415   :  { %1869 = vst [vmem:[#allocation2 + $0xa8] sm:$0xff] %v1795_v36  ;;  %v1790_v38 = vadd.f32 %v3078_v59, %v1789_v37 }
 0x416   :  { %v2523_v39 = vpop.f32.mrf.mxu0 }
 0x417   :  { %1868 = vst [vmem:[#allocation2 + $0xa0] sm:$0xff] %v1790_v38  ;;  %v1805_v40 = vadd.f32 %v2523_v39, %v3078_v59 }
 0x418   :  { %v1799_v41 = vpop.f32.mrf.mxu0 }
 0x419   :  { %1871 = vst [vmem:[#allocation2 + $0xb8] sm:$0xff] %v1805_v40  ;;  %v1800_v42 = vadd.f32 %v3078_v59, %v1799_v41 }
 0x41a   :  { %v2526_v43 = vpop.f32.mrf.mxu0 }
 0x41b   :  { %1870 = vst [vmem:[#allocation2 + $0xb0] sm:$0xff] %v1800_v42  ;;  %v1815_v45 = vadd.f32 %v2526_v43, %v3078_v59 }
 0x41c   :  { %v1809_v46 = vpop.f32.mrf.mxu0 }
 0x41d   :  { %1873 = vst [vmem:[#allocation2 + $0xc8] sm:$0xff] %v1815_v45  ;;  %v1810_v47 = vadd.f32 %v3078_v59, %v1809_v46 }
 0x41e   :  { %v2529_v49 = vpop.f32.mrf.mxu0 }
 0x41f   :  { %1872 = vst [vmem:[#allocation2 + $0xc0] sm:$0xff] %v1810_v47  ;;  %v1825_v50 = vadd.f32 %v2529_v49, %v3078_v59 }
 0x420   :  { %v1819_v51 = vpop.f32.mrf.mxu0 }
 0x421   :  { %1875 = vst [vmem:[#allocation2 + $0xd8] sm:$0xff] %v1825_v50  ;;  %v1820_v48 = vadd.f32 %v3078_v59, %v1819_v51 }
 0x422   :  { %v2532_v52 = vpop.f32.mrf.mxu0 }
 0x423   :  { %1874 = vst [vmem:[#allocation2 + $0xd0] sm:$0xff] %v1820_v48  ;;  %v1835_v53 = vadd.f32 %v2532_v52, %v3078_v59 }
 0x424   :  { %v1829_v17 = vpop.f32.mrf.mxu0 }
 0x425   :  { %1877 = vst [vmem:[#allocation2 + $0xe8] sm:$0xff] %v1835_v53  ;;  %v1830_v54 = vadd.f32 %v3078_v59, %v1829_v17 }
 0x426   :  { %v2535_v56 = vpop.f32.mrf.mxu0 }
 0x427   :  { %1876 = vst [vmem:[#allocation2 + $0xe0] sm:$0xff] %v1830_v54  ;;  %v1845_v57 = vadd.f32 %v2535_v56, %v3078_v59 }
 0x428   :  { %v1839_v58 = vpop.f32.mrf.mxu0 }
 0x429   :  { %1879 = vst [vmem:[#allocation2 + $0xf8] sm:$0xff] %v1845_v57  ;;  %v1840_v60 = vadd.f32 %v3078_v59, %v1839_v58 }
 0x42b   :  { %1878 = vst [vmem:[#allocation2 + $0xf0] sm:$0xff] %v1840_v60 }
 0x42c   :  { %2558 = shalt.err (!%p2555_p4)
}
 0x42d   :  { %s2570_s29 = smov 128   ;;  %s2571_s30 = smov 8  }
 0x42e   :  { %1891 = dma.vmem_to_hbm [thread:$0]  %s1886_s28, 4096, %s3120_s5, [#allocation3], %s2570_s29, %s2570_s29, %s2571_s30  }
 0x42f   :  { %2567 = dma.done.wait [#allocation3], 4096  }
 0x430   :  { %2568 = vsyncadd [#allocation3], 4294963200 }
 0x431   :  { %1895 = vsyncpa [#allocation3], 1 }

</bundles_post_ra>
